<compile_context>
chip_gen: v6e
topology: v6e:2x2x1
jax: 0.10.0
libtpu: 0.0.40
codegen_flags: <defaults>
</compile_context>

<pallas_src>
import jax
import jax.numpy as jnp
from jax.experimental import pallas as pl
from jax.experimental.pallas import tpu as pltpu


# Tile-size targets (elements).  256x512 f32 = 512 KiB per tile; with 2-deep
# buffering on both the input and output stream that is ~2 MiB of VMEM,
# comfortably inside every generation's scoped limit (incl. v7x's 64 MiB part).
_TARGET_LANE_TILE = 512      # dims constrained to multiples of 128
_TARGET_SUBLANE_TILE = 256   # dims constrained only to the sublane granularity
_VMEM_LIMIT_BYTES = 32 * 1024 * 1024


def _sublane_granularity(dtype) -> int:
    """Packed-sublane granularity per dtype width: (8,128) f32, (16,128) bf16, (32,128) i8."""
    itemsize = jnp.dtype(dtype).itemsize
    if itemsize >= 4:
        return 8
    if itemsize == 2:
        return 16
    return 32


def _pick_tile(dim_size: int, gran: int, target: int) -> int:
    """Largest multiple of `gran` that divides dim_size and is <= target.

    Falls back to the full dimension (always a legal block extent) when the
    dimension is small or has no aligned divisor, so no remainder handling is
    ever needed.
    """
    if dim_size <= target:
        return dim_size
    t = (target // gran) * gran
    while t >= gran:
        if dim_size % t == 0:
            return t
        t -= gran
    return dim_size


def pallas_transpose(x: jax.Array, dim0: int, dim1: int) -> jax.Array:
    """Equivalent of torch.Tensor.transpose(dim0, dim1) via a tiled Pallas kernel."""
    ndim = x.ndim
    d0 = dim0 % ndim
    d1 = dim1 % ndim
    if d0 == d1:
        return x
    d0, d1 = sorted((d0, d1))

    perm = list(range(ndim))
    perm[d0], perm[d1] = perm[d1], perm[d0]
    perm = tuple(perm)
    out_shape = tuple(x.shape[p] for p in perm)

    gran = _sublane_granularity(x.dtype)

    def out_pos(k: int) -> int:
        # Position of input dim k in the output array.
        if k == d0:
            return d1
        if k == d1:
            return d0
        return k

    # Choose the block extent per INPUT dimension.  A dim that lands in the lane
    # position (last axis) of either the input or the output tile must be a
    # multiple of 128 (or the full dim); sublane-position dims must be a
    # multiple of the dtype granularity (or full); pure leading dims get 1.
    in_block = []
    for k in range(ndim):
        need_lane = (k == ndim - 1) or (out_pos(k) == ndim - 1)
        need_sub = (k == ndim - 2) or (out_pos(k) == ndim - 2)
        if need_lane:
            # 128 is a multiple of every sublane granularity, so it satisfies
            # both constraints at once and keeps output stores lane-dense.
            in_block.append(_pick_tile(x.shape[k], 128, _TARGET_LANE_TILE))
        elif need_sub:
            in_block.append(_pick_tile(x.shape[k], gran, _TARGET_SUBLANE_TILE))
        else:
            in_block.append(1)
    in_block = tuple(in_block)

    # Output block = permuted input block; output block index = permuted grid index.
    out_block = tuple(in_block[perm[k]] for k in range(ndim))
    grid = tuple(x.shape[k] // in_block[k] for k in range(ndim))

    def in_index(*idx):
        return idx

    def out_index(*idx):
        return tuple(idx[perm[k]] for k in range(ndim))

    # If both swapped dims have block extent 1 the permutation is carried
    # entirely by the index_maps and the kernel is a pure copy (no XLU work).
    if in_block[d0] == 1 and in_block[d1] == 1:
        def kernel(x_ref, o_ref):
            o_ref[...] = x_ref[...]
    else:
        def kernel(x_ref, o_ref):
            # Tile-local axis swap (lowers to XLU transposes on the last dims).
            o_ref[...] = jnp.swapaxes(x_ref[...], d0, d1)
    # TODO(synk): for bf16/int8 with even channel counts, packing pairs/quads to
    # u32 via pltpu.bitcast before the swap would halve/quarter the XLU work.

    return pl.pallas_call(
        kernel,
        out_shape=jax.ShapeDtypeStruct(out_shape, x.dtype),
        grid=grid,
        in_specs=[pl.BlockSpec(in_block, in_index)],
        out_specs=pl.BlockSpec(out_block, out_index),
        compiler_params=pltpu.CompilerParams(
            # Pure permutation: every output block is written exactly once, so
            # every grid axis is parallel (v7x megacore shards them across TCs).
            dimension_semantics=("parallel",) * ndim,
            vmem_limit_bytes=_VMEM_LIMIT_BYTES,
        ),
    )(x)


class Transpose:
    """JAX/Pallas mirror of the PyTorch Transpose module (no parameters)."""

    def __init__(self, dim0: int, dim1: int, min_pallas_bytes: int = 1 << 18):
        self.dim0 = dim0
        self.dim1 = dim1
        self.min_pallas_bytes = min_pallas_bytes

    def __call__(self, x: jax.Array) -> jax.Array:
        # Tiny tensors: a standalone copy kernel cannot beat an XLA transpose
        # fused into the consumer, so skip Pallas below the threshold.
        if x.size * jnp.dtype(x.dtype).itemsize < self.min_pallas_bytes:
            return jnp.swapaxes(x, self.dim0, self.dim1)
        return pallas_transpose(x, self.dim0, self.dim1)


if __name__ == "__main__":
    key = jax.random.PRNGKey(0)
    k1, k2, k3 = jax.random.split(key, 3)

    # 1) Module-sized (B, C, L) demo, channels-first as in PyTorch.
    B, C, L = 2, 16, 128
    x_small = jax.random.normal(k1, (B, C, L), dtype=jnp.float32)
    y = jax.block_until_ready(jax.jit(lambda a: pallas_transpose(a, 1, 2))(x_small))
    y_ref = jnp.swapaxes(x_small, 1, 2)
    assert y.shape == (B, L, C) and y.dtype == x_small.dtype
    assert bool(jnp.array_equal(y, y_ref))

    # Negative-dim convention (same semantics as torch).
    y_neg = jax.block_until_ready(pallas_transpose(x_small, -2, -1))
    assert bool(jnp.array_equal(y_neg, y_ref))

    # 2) Larger slab exercising the tiled path (grid > 1, lane-dense output).
    Bb, Cb, Lb = 2, 256, 1024
    x_big = jax.random.normal(k2, (Bb, Cb, Lb), dtype=jnp.float32)
    mod = Transpose(1, 2)
    y_big = jax.block_until_ready(jax.jit(mod.__call__)(x_big))
    assert bool(jnp.array_equal(y_big, jnp.swapaxes(x_big, 1, 2)))

    # bf16 path (packed (16,128) sublane granularity).
    x_bf = x_big.astype(jnp.bfloat16)
    y_bf = jax.block_until_ready(pallas_transpose(x_bf, 1, 2))
    assert bool(jnp.array_equal(y_bf, jnp.swapaxes(x_bf, 1, 2)))

    # 3) Leading-axis swap: permutation carried purely by index_maps (copy kernel).
    x4 = jax.random.normal(k3, (2, 4, 16, 128), dtype=jnp.float32)
    y4 = jax.block_until_ready(pallas_transpose(x4, 0, 1))
    assert bool(jnp.array_equal(y4, jnp.swapaxes(x4, 0, 1)))

    # 4) Tiny-tensor gate in the module wrapper (falls back to fused XLA op).
    y_tiny = jax.block_until_ready(Transpose(1, 2)(x_small))
    assert bool(jnp.array_equal(y_tiny, y_ref))

    print("KERNEL_OK")
</pallas_src>

<mosaic_0001>
module attributes {stable_mosaic.version = 11 : i64} {
  func.func @kernel(%arg0: i32, %arg1: i32, %arg2: i32, %arg3: memref<1x16x128xf32, #tpu.memory_space<vmem>>, %arg4: memref<1x128x16xf32, #tpu.memory_space<vmem>>) attributes {dimension_semantics = [#tpu.dimension_semantics<parallel>, #tpu.dimension_semantics<parallel>, #tpu.dimension_semantics<parallel>], iteration_bounds = array<i64: 2, 1, 1>, scalar_prefetch = 0 : i64, scratch_operands = 0 : i64, tpu.core_type = #tpu.core_type<tc>, window_params = [{transform_indices = @transform_0, window_bounds = array<i64: 1, 16, 128>}, {transform_indices = @transform_1, window_bounds = array<i64: 1, 128, 16>}]} {
    %c0 = arith.constant 0 : index
    %c0_0 = arith.constant 0 : index
    %c0_1 = arith.constant 0 : index
    %0 = vector.load %arg3[%c0, %c0_0, %c0_1] : memref<1x16x128xf32, #tpu.memory_space<vmem>>, vector<1x16x128xf32>
    %1 = tpu.transpose %0, [0, 2, 1] : vector<1x16x128xf32> -> vector<1x128x16xf32>
    %c0_2 = arith.constant 0 : index
    %c0_3 = arith.constant 0 : index
    %c0_4 = arith.constant 0 : index
    %2 = vector.load %arg4[%c0_2, %c0_3, %c0_4] : memref<1x128x16xf32, #tpu.memory_space<vmem>>, vector<1x128x16xf32>
    tpu.vector_store %arg4[%c0_2, %c0_3, %c0_4], %1 {strides = array<i32>} : memref<1x128x16xf32, #tpu.memory_space<vmem>>, vector<1x128x16xf32>,
    return
  }
  func.func @transform_0(%arg0: i32, %arg1: i32, %arg2: i32) -> (i32, i32, i32) {
    %c0_i32 = arith.constant 0 : i32
    return %arg0, %arg1, %arg2 : i32, i32, i32
  }
  func.func @transform_1(%arg0: i32, %arg1: i32, %arg2: i32) -> (i32, i32, i32) {
    %c0_i32 = arith.constant 0 : i32
    return %arg0, %arg2, %arg1 : i32, i32, i32
  }
}

</mosaic_0001>

<bundles_post_ra>
// kernel: _lambda_.1
= control target key start
LH: loop header
LB: loop body
LE: loop exit
PB: predicated region body
PF: predicated region fallthrough
CT: control target
= control target key end

     0   :  { %6 = vsyncpa [#allocation3], 0  ;;  %s639_s0 = inlined_call_operand.hbm [shape: f32[2,16,128], index: 0, kind: input, shape index: {}]   ;;  %s640_s1 = inlined_call_operand.vmem [shape: f32[2,128,16], index: 1, kind: output, shape index: {}]  }
   0x1   :  { %8 = vsyncpa [#allocation3 + $0x1], 0  ;;  %s509_s6 = smov 0   ;;  %s511_s7 = smov 0  }
   0x2   :  { %s513_s8 = smov 0   ;;  %s515_s9 = smov 0  }
   0x3   :  { %s517_s10 = smov 0   ;;  %s519_s11 = smov 0  }
   0x4 LB: > { %s343_s12 = sadd.s32 4294967295, %s494_s11   ;;  %s33_s13 = sadd.s32 1, %s490_s10  ;;  %s494_s11 = sphi %s519_s11, %s14_s11   ;;  %s490_s10 = sphi %s517_s10, %s648_s10   ;;  %s486_s9 = sphi %s515_s9, %s647_s9   ;;  %s482_s8 = sphi %s513_s8, %s646_s8   ;;  %s478_s7 = sphi %s511_s7, %s645_s7   ;;  %s474_s6 = sphi %s509_s6, %s644_s6  }
   0x5   : > { %p35_p0 = scmp.ge.s32.totalorder %s33_s13, 2  ;;  %s44_s14 = sadd.s32 1, %s482_s8 }
   0x6   : > { %p51_p1 = scmp.ne.s32.totalorder %s482_s8, %s478_s7  ;;  %p52_p2 = scmp.eq.s32.totalorder %s494_s11, 0 }
   0x7   : > { %s650_s13 = smov (%p35_p0, %s33_s13), 0  ;;  %p57_p4 = scmp.ne.s32.totalorder %s478_s7, %s474_s6 }
   0x8   : > { %p545_p3 = por %p52_p2, %p51_p1  ;;  %s37_s16 = ssub.s32 %s490_s10, %s650_s13 }
   0x9   : > { %p58_p5 = scmp.eq.s32.totalorder %s343_s12, 0  ;;  %p42_p6 = scmp.eq.s32.totalorder %s37_s16, 0 }
   0xa   : > { %p364_p8 = scmp.lt.s32.totalorder %s494_s11, 2  ;;  %s111_s19 = sand.u32 1, %s482_s8  }
   0xb   : > { %p552_p7 = por %p58_p5, %p57_p4  ;;  %s356_s20 = sshll.u32 %s490_s10, 8 }
   0xc   : > { %s558_s18 = scalar_select %p42_p6, %s482_s8, %s44_s14  }
   0xd   : > { %s347_s21 = sshll.u32 %s111_s19, 4  ;;  %s124_s24 = scalar_lea.hbm %s639_s0, %s356_s20 }
   0xe   : > { %s115_s25 = scalar_lea.vmem [#allocation2], %s347_s21  ;;  %p567_p9 = pnand %p364_p8, %p545_p3 }
   0xf   : > { %s125_s26 = sshll.u32 %s115_s25, 4  ;;  %s112_s28 = scalar_lea.sflag [#allocation3], %s111_s19  ;;  %s126_s26 = int_to_ptr.vmem [resolvable:$true] %s125_s26 }
  0x10   : > { %p418_p10 = pneg %p567_p9  ;;  %s429_s29 = scalar_lea.vmem %s126_s26, 256 }
  0x11   : > { %p430_p11 = scmp.ne.s32.totalorder %s126_s26, %s429_s29  ;;  %s496_s30 = smov [#allocation2]  }
  0x12   : > { %s434_s2 = sshll.u32 %s496_s30, 4  ;;  %s435_s2 = int_to_ptr.vmem [resolvable:$false] %s434_s2 }
  0x13   : > { %p432_p12 = pnand %p430_p11, %p418_p10  ;;  %s436_s3 = scalar_lea.vmem %s435_s2, 512 }
  0x14   : > { %p437_p0 = scmp.lt.s32.totalorder %s126_s26, %s435_s2  ;;  %p438_p1 = scmp.lt.s32.totalorder %s436_s3, %s429_s29 }
  0x15   : > { %p433_p13 = pneg %p432_p12 }
  0x16   : > { %p439_p2 = por %p438_p1, %p437_p0 }
  0x18   : > { %p440_p3 = pnand %p439_p2, %p433_p13 }
  0x1a   : > { %443 = shalt.err (!%p440_p3)
}
  0x1b   : > { %s497_s4 = smov 128   ;;  %s498_s5 = smov 8  }
  0x1c   : > { %363 = dma.hbm_to_vmem [thread:$0]  (!%p567_p9), %s124_s24, 256, %s126_s26, %s112_s28, %s497_s4, %s497_s4, %s498_s5  }
  0x1d   : > { %p350_p4 = scmp.ge.s32.totalorder %s494_s11, 1  ;;  %p133_p5 = scmp.lt.s32.totalorder %s494_s11, 3 }
  0x1f   : > { %p134_p6 = pnand %p350_p4, %p133_p5 }
  0x20   : > { %s139_s6 = sand.u32 (!%p134_p6), 1, %s478_s7  }
  0x21   : > { %137 = sbr.rel (%p134_p6) target bundleno = 226 (0xe2), region = 24  ;;  %s351_s12 = sshll.u32 (!%p134_p6), %s139_s6, 4 }
  0x22   : > { %s140_s14 = scalar_lea.sflag (!%p134_p6), [#allocation3], %s139_s6  ;;  %s143_s15 = scalar_lea.vmem (!%p134_p6), [#allocation2], %s351_s12 }
  0x26   : > { %469 = dma.done.wait (%p552_p7), %s140_s14, 256  }
  0x27   : > { %471 = vsyncadd (%p552_p7), %s140_s14, 4294967040  ;;  %v183_v0 = vld [vmem:[%s143_s15] sm:$0xff]  ;;  %v184_v1 = vld [vmem:[%s143_s15 + $0x8] sm:$0xff]  ;;  %p171_p8 = scmp.lt.s32.totalorder %s486_s9, 1  ;;  %vm217_vm0 = vcmask 130048  }
  0x28   : > { %185 = vxpose.xlu0.b32.start [1/2] (short) %v183_v0, 128 }
  0x29   : > { %s652_s9 = smov (!%p171_p8, %s486_s9), 1 }
  0x2a   : > { %s357_s16 = sshll.u32 %s652_s9, 7 }
  0x2b   : > { %s587_s21 = scalar_lea.vmem %s640_s1, %s357_s16 }
  0x2c   : > { %186 = vxpose.xlu0.b32.end [2/2] (short) %v184_v1, 128 }
  0xa4   : > { %v201_v2 = vpop.trf.xlu0 }
  0xa5   : > { %218 = vst.msk [vmem:[%s587_s21] sm:$0xff] %vm217_vm0, %v201_v2 }
  0xa8   : > { %v202_v3 = vpop.trf.xlu0 }
  0xa9   : > { %219 = vst.msk [vmem:[%s587_s21 + $0x8] sm:$0xff] %vm217_vm0, %v202_v3 }
  0xac   : > { %v203_v4 = vpop.trf.xlu0 }
  0xad   : > { %220 = vst.msk [vmem:[%s587_s21 + $0x10] sm:$0xff] %vm217_vm0, %v203_v4 }
  0xb0   : > { %v204_v5 = vpop.trf.xlu0 }
  0xb1   : > { %221 = vst.msk [vmem:[%s587_s21 + $0x18] sm:$0xff] %vm217_vm0, %v204_v5 }
  0xb4   : > { %v205_v6 = vpop.trf.xlu0 }
  0xb5   : > { %222 = vst.msk [vmem:[%s587_s21 + $0x20] sm:$0xff] %vm217_vm0, %v205_v6 }
  0xb8   : > { %v206_v7 = vpop.trf.xlu0 }
  0xb9   : > { %223 = vst.msk [vmem:[%s587_s21 + $0x28] sm:$0xff] %vm217_vm0, %v206_v7 }
  0xbc   : > { %v207_v8 = vpop.trf.xlu0 }
  0xbd   : > { %224 = vst.msk [vmem:[%s587_s21 + $0x30] sm:$0xff] %vm217_vm0, %v207_v8 }
  0xc0   : > { %v208_v9 = vpop.trf.xlu0 }
  0xc1   : > { %225 = vst.msk [vmem:[%s587_s21 + $0x38] sm:$0xff] %vm217_vm0, %v208_v9 }
  0xc4   : > { %v209_v10 = vpop.trf.xlu0 }
  0xc5   : > { %226 = vst.msk [vmem:[%s587_s21 + $0x40] sm:$0xff] %vm217_vm0, %v209_v10 }
  0xc8   : > { %v210_v11 = vpop.trf.xlu0 }
  0xc9   : > { %227 = vst.msk [vmem:[%s587_s21 + $0x48] sm:$0xff] %vm217_vm0, %v210_v11 }
  0xcc   : > { %v211_v12 = vpop.trf.xlu0 }
  0xcd   : > { %228 = vst.msk [vmem:[%s587_s21 + $0x50] sm:$0xff] %vm217_vm0, %v211_v12 }
  0xd0   : > { %v212_v13 = vpop.trf.xlu0 }
  0xd1   : > { %229 = vst.msk [vmem:[%s587_s21 + $0x58] sm:$0xff] %vm217_vm0, %v212_v13 }
  0xd4   : > { %v213_v14 = vpop.trf.xlu0 }
  0xd5   : > { %230 = vst.msk [vmem:[%s587_s21 + $0x60] sm:$0xff] %vm217_vm0, %v213_v14 }
  0xd8   : > { %v214_v15 = vpop.trf.xlu0 }
  0xd9   : > { %231 = vst.msk [vmem:[%s587_s21 + $0x68] sm:$0xff] %vm217_vm0, %v214_v15 }
  0xdc   : > { %v215_v16 = vpop.trf.xlu0 }
  0xdd   : > { %232 = vst.msk [vmem:[%s587_s21 + $0x70] sm:$0xff] %vm217_vm0, %v215_v16 }
  0xe0   : > { %v216_v17 = vpop.trf.xlu0 }
  0xe1   : > { %233 = vst.msk [vmem:[%s587_s21 + $0x78] sm:$0xff] %vm217_vm0, %v216_v17 }
  0xe2 PF: > { %s14_s11 = sadd.s32 1, %s494_s11   ;;  %s644_s6 = smov %s478_s7 }
  0xe3   : > { %p11_p7 = scmp.ge.s32.totalorder %s14_s11, 4   ;;  %s645_s7 = smov %s482_s8 }
  0xe4   : > { %s646_s8 = smov %s558_s18  ;;  %s647_s9 = smov %s490_s10 }
  0xe5   : > { %s648_s10 = smov %s650_s13  ;;  %13 = sbr.rel (!%p11_p7) target bundleno = 4 (0x4), region = 64 }
  0xea   :  { %270 = vsyncpa [#allocation3], 1 }
  0xeb   :  { %272 = vsyncpa [#allocation3 + $0x1], 1 }

</bundles_post_ra>
